<compile_context>
chip_gen: v6e
topology: v6e:2x2x1
jax: 0.10.0
libtpu: 0.0.40
codegen_flags: <defaults>
</compile_context>

<pallas_src>
import functools
import math

import numpy as np
import jax
import jax.numpy as jnp
from jax.experimental import pallas as pl
from jax.experimental.pallas import tpu as pltpu

EPS = 1e-5  # nn.BatchNorm1d default eps


def _round_up(x, m):
    return ((x + m - 1) // m) * m


def _cdiv(a, b):
    return -(-a // b)


# --------------------------------------------------------------------------
# Kernel: fused (Linear w/ folded BN) -> ReLU, three layers, one batch tile.
# --------------------------------------------------------------------------
def encoder_kernel(x_ref,
                   w1_ref, b1_ref, w2_ref, b2_ref, w3_ref, b3_ref,
                   out_ref):
    def layer(h, w_ref, b_ref, out_dtype):
        # bf16 x bf16 on the MXU with f32 accumulation.
        acc = jnp.dot(h, w_ref[...], preferred_element_type=jnp.float32)
        # f32 epilogue (bias + ReLU) on the VPU, then narrow for the next layer.
        return jnp.maximum(acc + b_ref[...], 0.0).astype(out_dtype)

    h = layer(x_ref[...], w1_ref, b1_ref, jnp.bfloat16)
    h = layer(h, w2_ref, b2_ref, jnp.bfloat16)
    out_ref[...] = layer(h, w3_ref, b3_ref, out_ref.dtype)


# --------------------------------------------------------------------------
# Parameter preprocessing (done once, outside the kernel).
# --------------------------------------------------------------------------
def fold_bn_into_linear(raw_layers, weight_dtype=jnp.bfloat16):
    """Fold eval-mode BatchNorm1d into the preceding Linear.

    raw_layers: list of (W(out,in), b(out,), gamma(out,), beta(out,),
                          running_mean(out,), running_var(out,)).
    Returns list of (W_folded (in,out) weight_dtype, b_folded (1,out) f32).
    """
    folded = []
    for w, b, g, beta, rm, rv in raw_layers:
        scale = g * jax.lax.rsqrt(rv + EPS)                 # (out,)
        w_f = (w * scale[:, None]).T                        # (in, out)
        b_f = (b - rm) * scale + beta                       # (out,)
        folded.append((w_f.astype(weight_dtype),
                       b_f.reshape(1, -1).astype(jnp.float32)))
    return folded


def pad_features(folded, in_dim, lane=256):
    """Zero-pad input features and every layer's output features to a
    multiple of `lane` (256 keeps the v6e/v7x 256-wide MXU fully occupied;
    v5e only needs 128 but the extra zero padding is harmless).

    Zero rows/cols + zero-padded bias leave the original outputs unchanged
    and the padded columns exactly 0 after ReLU, so they feed zero into the
    next (zero-row) weight slice."""
    in_p = _round_up(in_dim, lane)
    padded, k_prev = [], in_p
    for w, b in folded:
        kin, kout = w.shape
        kout_p = _round_up(kout, lane)
        w_p = jnp.zeros((k_prev, kout_p), w.dtype).at[:kin, :kout].set(w)
        b_p = jnp.zeros((1, kout_p), b.dtype).at[:, :kout].set(b)
        padded.append((w_p, b_p))
        k_prev = kout_p
    return padded, in_p


# --------------------------------------------------------------------------
# Tiling / VMEM helpers.
# --------------------------------------------------------------------------
def _choose_tile(batch, batch_tile):
    rb = _round_up(batch, 8)
    tile = min(_round_up(batch_tile, 8), rb)
    # At least 2 grid steps when the batch allows it, so v7x's two
    # TensorCores both get work under dimension_semantics=("parallel",).
    if rb // tile < 2 and rb >= 16:
        tile = _round_up(_cdiv(rb, 2), 8)
    # Shrink the tile to the smallest 8-row multiple that keeps the same
    # number of grid steps -> minimal dead compute on a ragged batch tail.
    steps = _cdiv(rb, tile)
    tile = _round_up(_cdiv(rb, steps), 8)
    return tile


def _vmem_budget_bytes():
    try:
        cap = int(pltpu.get_tpu_info().vmem_capacity_bytes)
    except Exception:
        cap = 64 << 20  # conservative: v7x per-TensorCore VMEM
    return (cap * 3) // 4  # headroom for compiler internal scratch


# --------------------------------------------------------------------------
# pallas_call wrapper.
# --------------------------------------------------------------------------
@functools.partial(
    jax.jit,
    static_argnames=("batch_tile", "out_dtype", "single_buffer_weights"))
def _ae_encoder_impl(x, w1, b1, w2, b2, w3, b3, *,
                     batch_tile, out_dtype, single_buffer_weights):
    batch, in_dim = x.shape
    in_dim_p = w1.shape[0]
    h1, h2, out_pad = w1.shape[1], w2.shape[1], w3.shape[1]
    params = (w1, b1, w2, b2, w3, b3)

    # Pad input features to the padded first-layer K and cast to bf16
    # (halves the per-tile input DMA; the MXU operand is bf16 regardless).
    if in_dim_p != in_dim:
        x = jnp.pad(x, ((0, 0), (0, in_dim_p - in_dim)))
    x = x.astype(jnp.bfloat16)

    tile = _choose_tile(batch, batch_tile)
    padded_batch = _round_up(batch, tile)
    if padded_batch != batch:
        x = jnp.pad(x, ((0, padded_batch - batch), (0, 0)))
    grid = (padded_batch // tile,)

    # Weights/biases are grid-invariant: constant index_map (DMA'd once) and,
    # when supported, a single buffer instead of the default double buffer.
    pkw = {"pipeline_mode": pl.Buffered(1)} if single_buffer_weights else {}
    in_specs = [pl.BlockSpec((tile, in_dim_p), lambda i: (i, 0))]
    in_specs += [pl.BlockSpec(p.shape, lambda i: (0, 0), **pkw) for p in params]
    out_spec = pl.BlockSpec((tile, out_pad), lambda i: (i, 0))

    # Honest VMEM accounting: double-buffered bf16 x / out tiles, resident
    # parameters, bf16 inter-layer activations + one f32 epilogue temp.
    out_isize = np.dtype(out_dtype).itemsize
    act_bytes = 2 * tile * in_dim_p * 2 + 2 * tile * out_pad * out_isize
    inter_bytes = tile * (h1 + h2) * 2 + tile * max(h1, h2, out_pad) * 4
    pmult = 1 if single_buffer_weights else 2
    param_bytes = pmult * sum(int(p.size) * p.dtype.itemsize for p in params)
    needed = act_bytes + inter_bytes + param_bytes + (4 << 20)
    vmem_limit = int(min(_vmem_budget_bytes(), max(needed, 32 << 20)))

    flops = 2 * padded_batch * (in_dim_p * h1 + h1 * h2 + h2 * out_pad)
    bytes_accessed = (padded_batch * in_dim_p * 2
                      + param_bytes // pmult
                      + padded_batch * out_pad * out_isize)
    cost = pl.CostEstimate(flops=int(flops), transcendentals=0,
                           bytes_accessed=int(bytes_accessed))

    y = pl.pallas_call(
        encoder_kernel,
        out_shape=jax.ShapeDtypeStruct((padded_batch, out_pad), out_dtype),
        grid=grid,
        in_specs=in_specs,
        out_specs=out_spec,
        compiler_params=pltpu.CompilerParams(
            dimension_semantics=("parallel",),
            vmem_limit_bytes=vmem_limit),
        cost_estimate=cost,
    )(x, *params)
    return y[:batch]


def ae_encoder_forward(x, padded_folded_params, embed_dim, batch_tile=256,
                       out_dtype=jnp.float32):
    """AE.encoder forward (eval mode) as a single fused Pallas kernel.

    Dropout is identity in eval mode; returns the latent `x` only (see the
    Decoder TODO at the top of this file).  Pass out_dtype=jnp.bfloat16 if a
    bf16 latent is acceptable (halves output writeback, helps v5e stores)."""
    flat = []
    for w, b in padded_folded_params:
        flat += [w, b]
    try:
        y = _ae_encoder_impl(x, *flat, batch_tile=batch_tile,
                             out_dtype=out_dtype, single_buffer_weights=True)
    except (TypeError, NotImplementedError):
        # Build doesn't accept pipeline_mode / pl.Buffered at construction.
        y = _ae_encoder_impl(x, *flat, batch_tile=batch_tile,
                             out_dtype=out_dtype, single_buffer_weights=False)
    except Exception as e:  # noqa: BLE001 - narrow, string-gated fallback
        msg = str(e).lower()
        if ("buffer" in msg) or ("pipeline" in msg):
            y = _ae_encoder_impl(x, *flat, batch_tile=batch_tile,
                                 out_dtype=out_dtype,
                                 single_buffer_weights=False)
        else:
            raise
    # Slice off output-lane padding.
    return y[:, :embed_dim]


# --------------------------------------------------------------------------
# Synthetic parameters + pure-JAX references (for verification).
# --------------------------------------------------------------------------
def init_raw_params(key, dims):
    """PyTorch-layout params: W (out,in), b (out,), BN gamma/beta/mean/var."""
    layers = []
    for din, dout in dims:
        key, kw, kb, kg, kbe, km, kv = jax.random.split(key, 7)
        bound = 1.0 / math.sqrt(din)
        w = jax.random.uniform(kw, (dout, din), jnp.float32, -bound, bound)
        b = jax.random.uniform(kb, (dout,), jnp.float32, -bound, bound)
        g = 1.0 + 0.1 * jax.random.normal(kg, (dout,), jnp.float32)
        beta = 0.1 * jax.random.normal(kbe, (dout,), jnp.float32)
        rm = 0.1 * jax.random.normal(km, (dout,), jnp.float32)
        rv = 1.0 + 0.1 * jax.random.uniform(kv, (dout,), jnp.float32)
        layers.append((w, b, g, beta, rm, rv))
    return layers


def reference_unfused(x, raw_layers):
    """Original eval-mode math in f32 (Linear -> BN(eval) -> ReLU) x 3."""
    h = x.astype(jnp.float32)
    for w, b, g, beta, rm, rv in raw_layers:
        h = h @ w.T + b
        h = (h - rm) * jax.lax.rsqrt(rv + EPS) * g + beta
        h = jnp.maximum(h, 0.0)
    return h


def reference_folded(x, folded):
    """Same folded bf16 operands and bf16 activation carries as the kernel."""
    h = x.astype(jnp.bfloat16)
    out = None
    for li, (w, b) in enumerate(folded):
        a = jnp.dot(h, w, preferred_element_type=jnp.float32) + b
        a = jnp.maximum(a, 0.0)
        if li < len(folded) - 1:
            h = a.astype(jnp.bfloat16)
        else:
            out = a
    return out


if __name__ == "__main__":
    # Small shapes consistent with the module (scaled-down 2048/1536/1024/728).
    batch = 200          # deliberately not a multiple of the batch tile
    input_size = 256
    fc_hidden1 = 192
    fc_hidden2 = 128
    embed_dim = 72       # not a multiple of 128/256 -> exercises lane padding

    key = jax.random.PRNGKey(0)
    kx, kp = jax.random.split(key)
    x = jax.random.normal(kx, (batch, input_size), jnp.float32)

    dims = [(input_size, fc_hidden1), (fc_hidden1, fc_hidden2),
            (fc_hidden2, embed_dim)]
    raw = init_raw_params(kp, dims)

    folded = fold_bn_into_linear(raw, weight_dtype=jnp.bfloat16)
    padded_folded, in_dim_padded = pad_features(folded, input_size, lane=256)

    latent = ae_encoder_forward(x, padded_folded, embed_dim, batch_tile=256)
    latent = jax.block_until_ready(latent)
    assert latent.shape == (batch, embed_dim)

    # Tight check vs. a reference using the identical bf16 folded operands
    # and bf16 inter-layer activations.
    ref_f = reference_folded(x, folded)
    assert jnp.allclose(latent, ref_f, atol=2e-3, rtol=2e-3), \
        "mismatch vs folded bf16 reference"

    # Looser check vs. the original unfused f32 Linear+BN+ReLU math
    # (differences come only from bf16 weight/activation quantization).
    ref_u = reference_unfused(x, raw)
    assert jnp.allclose(latent, ref_u, atol=1e-1, rtol=1e-1), \
        "mismatch vs unfused f32 reference"

    print("KERNEL_OK")
</pallas_src>

<mosaic_0001>
module attributes {stable_mosaic.version = 11 : i64} {
  func.func @encoder_kernel(%arg0: i32, %arg1: memref<104x256xbf16, #tpu.memory_space<vmem>>, %arg2: memref<256x256xbf16, #tpu.memory_space<vmem>>, %arg3: memref<1x256xf32, #tpu.memory_space<vmem>>, %arg4: memref<256x256xbf16, #tpu.memory_space<vmem>>, %arg5: memref<1x256xf32, #tpu.memory_space<vmem>>, %arg6: memref<256x256xbf16, #tpu.memory_space<vmem>>, %arg7: memref<1x256xf32, #tpu.memory_space<vmem>>, %arg8: memref<104x256xf32, #tpu.memory_space<vmem>>) attributes {dimension_semantics = [#tpu.dimension_semantics<parallel>], iteration_bounds = array<i64: 2>, scalar_prefetch = 0 : i64, scratch_operands = 0 : i64, tpu.core_type = #tpu.core_type<tc>, window_params = [{transform_indices = @transform_0, window_bounds = array<i64: 104, 256>}, {pipeline_mode = #tpu.pipeline_mode<synchronous>, transform_indices = @transform_1, window_bounds = array<i64: 256, 256>}, {pipeline_mode = #tpu.pipeline_mode<synchronous>, transform_indices = @transform_2, window_bounds = array<i64: 1, 256>}, {pipeline_mode = #tpu.pipeline_mode<synchronous>, transform_indices = @transform_3, window_bounds = array<i64: 256, 256>}, {pipeline_mode = #tpu.pipeline_mode<synchronous>, transform_indices = @transform_4, window_bounds = array<i64: 1, 256>}, {pipeline_mode = #tpu.pipeline_mode<synchronous>, transform_indices = @transform_5, window_bounds = array<i64: 256, 256>}, {pipeline_mode = #tpu.pipeline_mode<synchronous>, transform_indices = @transform_6, window_bounds = array<i64: 1, 256>}, {transform_indices = @transform_7, window_bounds = array<i64: 104, 256>}]} {
    %c0 = arith.constant 0 : index
    %c0_0 = arith.constant 0 : index
    %0 = vector.load %arg1[%c0, %c0_0] : memref<104x256xbf16, #tpu.memory_space<vmem>>, vector<104x256xbf16>
    %c0_1 = arith.constant 0 : index
    %c0_2 = arith.constant 0 : index
    %1 = vector.load %arg2[%c0_1, %c0_2] : memref<256x256xbf16, #tpu.memory_space<vmem>>, vector<256x256xbf16>
    %cst = arith.constant dense<0.000000e+00> : vector<104x256xf32>
    %2 = tpu.matmul %0, %1, %cst {dimension_numbers = #tpu.dot_dimension_numbers<[1], [0], [0], [1], [0, 0, 1, 1], [], []>} : vector<104x256xbf16>, vector<256x256xbf16>, vector<104x256xf32> -> vector<104x256xf32>
    %c0_3 = arith.constant 0 : index
    %c0_4 = arith.constant 0 : index
    %3 = vector.load %arg3[%c0_3, %c0_4] : memref<1x256xf32, #tpu.memory_space<vmem>>, vector<1x256xf32>
    %4 = vector.broadcast %3 : vector<1x256xf32> to vector<104x256xf32>
    %5 = arith.addf %2, %4 : vector<104x256xf32>
    %cst_5 = arith.constant 0.000000e+00 : f32
    %6 = vector.broadcast %cst_5 : f32 to vector<104x256xf32>
    %7 = arith.maximumf %5, %6 : vector<104x256xf32>
    %8 = arith.truncf %7 : vector<104x256xf32> to vector<104x256xbf16>
    %c0_6 = arith.constant 0 : index
    %c0_7 = arith.constant 0 : index
    %9 = vector.load %arg4[%c0_6, %c0_7] : memref<256x256xbf16, #tpu.memory_space<vmem>>, vector<256x256xbf16>
    %cst_8 = arith.constant dense<0.000000e+00> : vector<104x256xf32>
    %10 = tpu.matmul %8, %9, %cst_8 {dimension_numbers = #tpu.dot_dimension_numbers<[1], [0], [0], [1], [0, 0, 1, 1], [], []>} : vector<104x256xbf16>, vector<256x256xbf16>, vector<104x256xf32> -> vector<104x256xf32>
    %c0_9 = arith.constant 0 : index
    %c0_10 = arith.constant 0 : index
    %11 = vector.load %arg5[%c0_9, %c0_10] : memref<1x256xf32, #tpu.memory_space<vmem>>, vector<1x256xf32>
    %12 = vector.broadcast %11 : vector<1x256xf32> to vector<104x256xf32>
    %13 = arith.addf %10, %12 : vector<104x256xf32>
    %cst_11 = arith.constant 0.000000e+00 : f32
    %14 = vector.broadcast %cst_11 : f32 to vector<104x256xf32>
    %15 = arith.maximumf %13, %14 : vector<104x256xf32>
    %16 = arith.truncf %15 : vector<104x256xf32> to vector<104x256xbf16>
    %c0_12 = arith.constant 0 : index
    %c0_13 = arith.constant 0 : index
    %17 = vector.load %arg6[%c0_12, %c0_13] : memref<256x256xbf16, #tpu.memory_space<vmem>>, vector<256x256xbf16>
    %cst_14 = arith.constant dense<0.000000e+00> : vector<104x256xf32>
    %18 = tpu.matmul %16, %17, %cst_14 {dimension_numbers = #tpu.dot_dimension_numbers<[1], [0], [0], [1], [0, 0, 1, 1], [], []>} : vector<104x256xbf16>, vector<256x256xbf16>, vector<104x256xf32> -> vector<104x256xf32>
    %c0_15 = arith.constant 0 : index
    %c0_16 = arith.constant 0 : index
    %19 = vector.load %arg7[%c0_15, %c0_16] : memref<1x256xf32, #tpu.memory_space<vmem>>, vector<1x256xf32>
    %20 = vector.broadcast %19 : vector<1x256xf32> to vector<104x256xf32>
    %21 = arith.addf %18, %20 : vector<104x256xf32>
    %cst_17 = arith.constant 0.000000e+00 : f32
    %22 = vector.broadcast %cst_17 : f32 to vector<104x256xf32>
    %23 = arith.maximumf %21, %22 : vector<104x256xf32>
    %c0_18 = arith.constant 0 : index
    %c0_19 = arith.constant 0 : index
    %24 = vector.load %arg8[%c0_18, %c0_19] : memref<104x256xf32, #tpu.memory_space<vmem>>, vector<104x256xf32>
    tpu.vector_store %arg8[%c0_18, %c0_19], %23 {strides = array<i32>} : memref<104x256xf32, #tpu.memory_space<vmem>>, vector<104x256xf32>,
    return
  }
  func.func @transform_0(%arg0: i32) -> (i32, i32) {
    %c0_i32 = arith.constant 0 : i32
    %c0_i32_0 = arith.constant 0 : i32
    return %arg0, %c0_i32 : i32, i32
  }
  func.func @transform_1(%arg0: i32) -> (i32, i32) {
    %c0_i32 = arith.constant 0 : i32
    %c0_i32_0 = arith.constant 0 : i32
    %c0_i32_1 = arith.constant 0 : i32
    return %c0_i32, %c0_i32_0 : i32, i32
  }
  func.func @transform_2(%arg0: i32) -> (i32, i32) {
    %c0_i32 = arith.constant 0 : i32
    %c0_i32_0 = arith.constant 0 : i32
    %c0_i32_1 = arith.constant 0 : i32
    return %c0_i32, %c0_i32_0 : i32, i32
  }
  func.func @transform_3(%arg0: i32) -> (i32, i32) {
    %c0_i32 = arith.constant 0 : i32
    %c0_i32_0 = arith.constant 0 : i32
    %c0_i32_1 = arith.constant 0 : i32
    return %c0_i32, %c0_i32_0 : i32, i32
  }
  func.func @transform_4(%arg0: i32) -> (i32, i32) {
    %c0_i32 = arith.constant 0 : i32
    %c0_i32_0 = arith.constant 0 : i32
    %c0_i32_1 = arith.constant 0 : i32
    return %c0_i32, %c0_i32_0 : i32, i32
  }
  func.func @transform_5(%arg0: i32) -> (i32, i32) {
    %c0_i32 = arith.constant 0 : i32
    %c0_i32_0 = arith.constant 0 : i32
    %c0_i32_1 = arith.constant 0 : i32
    return %c0_i32, %c0_i32_0 : i32, i32
  }
  func.func @transform_6(%arg0: i32) -> (i32, i32) {
    %c0_i32 = arith.constant 0 : i32
    %c0_i32_0 = arith.constant 0 : i32
    %c0_i32_1 = arith.constant 0 : i32
    return %c0_i32, %c0_i32_0 : i32, i32
  }
  func.func @transform_7(%arg0: i32) -> (i32, i32) {
    %c0_i32 = arith.constant 0 : i32
    %c0_i32_0 = arith.constant 0 : i32
    return %arg0, %c0_i32 : i32, i32
  }
}

</mosaic_0001>

<bundles_post_ra>
// kernel: _ae_encoder_impl.1
= control target key start
LH: loop header
LB: loop body
LE: loop exit
PB: predicated region body
PF: predicated region fallthrough
CT: control target
= control target key end

     0   :  { %s1847_s24 = smov 0   ;;  %s2408_s0 = inlined_call_operand.vmem [shape: bf16[208,256], index: 0, kind: input, shape index: {}]   ;;  %s2409_s1 = inlined_call_operand.vmem [shape: bf16[256,256], index: 1, kind: input, shape index: {}]   ;;  %s2410_s2 = inlined_call_operand.vmem [shape: f32[1,256], index: 2, kind: input, shape index: {}]   ;;  %s2411_s3 = inlined_call_operand.vmem [shape: bf16[256,256], index: 3, kind: input, shape index: {}]   ;;  %s2412_s4 = inlined_call_operand.vmem [shape: f32[1,256], index: 4, kind: input, shape index: {}]   ;;  %s2413_s5 = inlined_call_operand.vmem [shape: bf16[256,256], index: 5, kind: input, shape index: {}]   ;;  %s2414_s6 = inlined_call_operand.vmem [shape: f32[1,256], index: 6, kind: input, shape index: {}]   ;;  %s2415_s7 = inlined_call_operand.vmem [shape: f32[208,256], index: 7, kind: output, shape index: {}]  }
   0x1 LB: > { %s1472_s25 = sadd.s32 4294967295, %s1805_s24   ;;  %p1476_p0 = scmp.ge.s32.totalorder %s1805_s24, 1  ;;  %s1805_s24 = sphi %s1847_s24, %s17_s24  }
   0x2   : > { %p239_p1 = scmp.lt.s32.totalorder %s1805_s24, 3 }
   0x4   : > { %p240_p2 = pnand %p1476_p0, %p239_p1 }
   0x5   : > { %s273_s13 = smul.u32 (!%p240_p2), 13, %s1472_s25 }
   0x6   : > { %243 = sbr.rel (%p240_p2) target bundleno = 736 (0x2e0), region = 48 }
   0x7   : > { %p274_p3 = scmp.lt.s32.totalorder (!%p240_p2), %s273_s13, 25 }
   0xb   : > { %v1635_v0 = vld [vmem:[%s2409_s1 + $0x74] ss:$8 sps:$4 sm:$0xff]   ;;  %v1637_v1 = vld [vmem:[%s2409_s1 + $0x70] ss:$8 sps:$4 sm:$0xff]   ;;  %v1638_v2 = vld [vmem:[%s2409_s1 + $0x64] ss:$8 sps:$4 sm:$0xff]  }
   0xc   : > { %571 = vmatprep.subr.bf16.mxu0 %v1635_v0  ;;  %v1640_v3 = vld [vmem:[%s2409_s1 + $0x60] ss:$8 sps:$4 sm:$0xff]   ;;  %v1641_v4 = vld [vmem:[%s2409_s1 + $0x54] ss:$8 sps:$4 sm:$0xff]   ;;  %v1643_v5 = vld [vmem:[%s2409_s1 + $0x50] ss:$8 sps:$4 sm:$0xff]  }
   0xd   : > { %572 = vmatpush1.bf16.msra.mxu0 %v1637_v1  ;;  %v1644_v6 = vld [vmem:[%s2409_s1 + $0x44] ss:$8 sps:$4 sm:$0xff]   ;;  %v1646_v7 = vld [vmem:[%s2409_s1 + $0x40] ss:$8 sps:$4 sm:$0xff]   ;;  %v1647_v8 = vld [vmem:[%s2409_s1 + $0x34] ss:$8 sps:$4 sm:$0xff]  }
   0xe   : > { %573 = vmatprep.subr.bf16.mxu0 %v1638_v2  ;;  %s2417_s13 = smov (!%p274_p3, %s273_s13), 25  ;;  %v1649_v9 = vld [vmem:[%s2409_s1 + $0x30] ss:$8 sps:$4 sm:$0xff]   ;;  %v1650_v10 = vld [vmem:[%s2409_s1 + $0x24] ss:$8 sps:$4 sm:$0xff]  }
   0xf   : > { %s1593_s27 = sshll.u32 %s2417_s13, 3  ;;  %v1652_v11 = vld [vmem:[%s2409_s1 + $0x20] ss:$8 sps:$4 sm:$0xff]   ;;  %v1653_v12 = vld [vmem:[%s2409_s1 + $0x14] ss:$8 sps:$4 sm:$0xff]   ;;  %s1594_s21 = sshll.u32 %s2417_s13, 4 }
  0x10   : > { %s1897_s9 = scalar_lea.vmem %s2408_s0, %s1593_s27  ;;  %v1655_v14 = vld [vmem:[%s2409_s1 + $0x10] ss:$8 sps:$4 sm:$0xff]   ;;  %v1656_v15 = vld [vmem:[%s2409_s1 + $0x4] ss:$8 sps:$4 sm:$0xff]   ;;  %v1658_v16 = vld [vmem:[%s2409_s1] ss:$8 sps:$4 sm:$0xff]   ;;  %s2352_s25 = scalar_lea.vmem %s2415_s7, %s1594_s21 }
  0x11   : > { %574 = vmatpush1.bf16.msra.mxu0 %v1640_v3  ;;  %v1685_v13 = vld [vmem:[%s1897_s9 + $0x4] ss:$8 sps:$4 sm:$0xff]   ;;  %v1659_v17 = vld [vmem:[%s2409_s1 + $0xf4] ss:$8 sps:$4 sm:$0xff]   ;;  %v1661_v18 = vld [vmem:[%s2409_s1 + $0xf0] ss:$8 sps:$4 sm:$0xff]  }
  0x12   : > { %575 = vmatprep.subr.bf16.mxu0 %v1641_v4  ;;  %603 = vmatprep.mubr.bf16.mxu0 %v1685_v13  ;;  %v1703_v19 = vld [vmem:[%s2411_s3 + $0x74] ss:$8 sps:$4 sm:$0xff]   ;;  %v1705_v20 = vld [vmem:[%s2411_s3 + $0x70] ss:$8 sps:$4 sm:$0xff]   ;;  %v1706_v21 = vld [vmem:[%s2411_s3 + $0x64] ss:$8 sps:$4 sm:$0xff]  }
  0x13   : > { %v1662_v22 = vld [vmem:[%s2409_s1 + $0xe4] ss:$8 sps:$4 sm:$0xff]   ;;  %916 = vmatprep.subr.bf16.mxu1 %v1703_v19  ;;  %v1708_v23 = vld [vmem:[%s2411_s3 + $0x60] ss:$8 sps:$4 sm:$0xff]   ;;  %v1709_v24 = vld [vmem:[%s2411_s3 + $0x54] ss:$8 sps:$4 sm:$0xff]  }
  0x14   : > { %917 = vmatpush1.bf16.msra.mxu1 %v1705_v20  ;;  %v1664_v25 = vld [vmem:[%s2409_s1 + $0xe0] ss:$8 sps:$4 sm:$0xff]   ;;  %v1665_v26 = vld [vmem:[%s2409_s1 + $0xd4] ss:$8 sps:$4 sm:$0xff]   ;;  %v1711_v27 = vld [vmem:[%s2411_s3 + $0x50] ss:$8 sps:$4 sm:$0xff]  }
  0x15   : > { %576 = vmatpush1.bf16.msra.mxu0 %v1643_v5  ;;  %918 = vmatprep.subr.bf16.mxu1 %v1706_v21  ;;  %v1712_v28 = vld [vmem:[%s2411_s3 + $0x44] ss:$8 sps:$4 sm:$0xff]   ;;  %v1667_v29 = vld [vmem:[%s2409_s1 + $0xd0] ss:$8 sps:$4 sm:$0xff]   ;;  %v1714_v31 = vld [vmem:[%s2411_s3 + $0x40] ss:$8 sps:$4 sm:$0xff]  }
  0x16   : > { %577 = vmatprep.subr.bf16.mxu0 %v1644_v6  ;;  %v1668_v30 = vld [vmem:[%s2409_s1 + $0xc4] ss:$8 sps:$4 sm:$0xff]   ;;  %v1715_v32 = vld [vmem:[%s2411_s3 + $0x34] ss:$8 sps:$4 sm:$0xff]   ;;  %v1670_v33 = vld [vmem:[%s2409_s1 + $0xc0] ss:$8 sps:$4 sm:$0xff]  }
  0x17   : > { %v1671_v34 = vld [vmem:[%s2409_s1 + $0xb4] ss:$8 sps:$4 sm:$0xff]   ;;  %v1673_v35 = vld [vmem:[%s2409_s1 + $0xb0] ss:$8 sps:$4 sm:$0xff]   ;;  %v1674_v37 = vld [vmem:[%s2409_s1 + $0xa4] ss:$8 sps:$4 sm:$0xff]  }
  0x18   : > { %919 = vmatpush1.bf16.msra.mxu1 %v1708_v23  ;;  %v1717_v36 = vld [vmem:[%s2411_s3 + $0x30] ss:$8 sps:$4 sm:$0xff]   ;;  %v1718_v38 = vld [vmem:[%s2411_s3 + $0x24] ss:$8 sps:$4 sm:$0xff]   ;;  %v1720_v39 = vld [vmem:[%s2411_s3 + $0x20] ss:$8 sps:$4 sm:$0xff]  }
  0x19   : > { %578 = vmatpush1.bf16.msra.mxu0 %v1646_v7  ;;  %920 = vmatprep.subr.bf16.mxu1 %v1709_v24  ;;  %v1721_v40 = vld [vmem:[%s2411_s3 + $0x14] ss:$8 sps:$4 sm:$0xff]   ;;  %v1676_v41 = vld [vmem:[%s2409_s1 + $0xa0] ss:$8 sps:$4 sm:$0xff]   ;;  %v1723_v43 = vld [vmem:[%s2411_s3 + $0x10] ss:$8 sps:$4 sm:$0xff]  }
  0x1a   : > { %579 = vmatprep.subr.bf16.mxu0 %v1647_v8  ;;  %v1677_v42 = vld [vmem:[%s2409_s1 + $0x94] ss:$8 sps:$4 sm:$0xff]   ;;  %v1724_v44 = vld [vmem:[%s2411_s3 + $0x4] ss:$8 sps:$4 sm:$0xff]   ;;  %v1679_v45 = vld [vmem:[%s2409_s1 + $0x90] ss:$8 sps:$4 sm:$0xff]  }
  0x1b   : > { %v1680_v46 = vld [vmem:[%s2409_s1 + $0x84] ss:$8 sps:$4 sm:$0xff]   ;;  %v1726_v47 = vld [vmem:[%s2411_s3] ss:$8 sps:$4 sm:$0xff]   ;;  %v1727_v48 = vld [vmem:[%s2411_s3 + $0xf4] ss:$8 sps:$4 sm:$0xff]  }
  0x1c   : > { %921 = vmatpush1.bf16.msra.mxu1 %v1711_v27  ;;  %v1682_v49 = vld [vmem:[%s2409_s1 + $0x80] ss:$8 sps:$4 sm:$0xff]   ;;  %v1729_v50 = vld [vmem:[%s2411_s3 + $0xf0] ss:$8 sps:$4 sm:$0xff]   ;;  %v1730_v52 = vld [vmem:[%s2411_s3 + $0xe4] ss:$8 sps:$4 sm:$0xff]  }
  0x1d   : > { %580 = vmatpush1.bf16.msra.mxu0 %v1649_v9  ;;  %922 = vmatprep.subr.bf16.mxu1 %v1712_v28  ;;  %v1683_v51 = vld [vmem:[%s1897_s9] ss:$8 sps:$4 sm:$0xff]   ;;  %v1686_v53 = vld [vmem:[%s1897_s9 + $0x14] ss:$8 sps:$4 sm:$0xff]   ;;  %v1735_v56 = vld [vmem:[%s2411_s3 + $0xd0] ss:$8 sps:$4 sm:$0xff]  }
  0x1e   : > { %581 = vmatprep.subr.bf16.mxu0 %v1650_v10  ;;  %v1732_v54 = vld [vmem:[%s2411_s3 + $0xe0] ss:$8 sps:$4 sm:$0xff]   ;;  %v1733_v55 = vld [vmem:[%s2411_s3 + $0xd4] ss:$8 sps:$4 sm:$0xff]   ;;  %v1688_v57 = vld [vmem:[%s1897_s9 + $0x10] ss:$8 sps:$4 sm:$0xff]  }
  0x1f   : > { %v1736_v58 = vld [vmem:[%s2411_s3 + $0xc4] ss:$8 sps:$4 sm:$0xff]   ;;  %v1738_v60 = vld [vmem:[%s2411_s3 + $0xc0] ss:$8 sps:$4 sm:$0xff]   ;;  %v1739_v61 = vld [vmem:[%s2411_s3 + $0xb4] ss:$8 sps:$4 sm:$0xff]  }
  0x20   : > { %923 = vmatpush1.bf16.msra.mxu1 %v1714_v31  ;;  %v1689_v59 = vld [vmem:[%s1897_s9 + $0x24] ss:$8 sps:$4 sm:$0xff]   ;;  %v1741_v62 = vld [vmem:[%s2411_s3 + $0xb0] ss:$8 sps:$4 sm:$0xff]   ;;  %v1691_v63 = vld [vmem:[%s1897_s9 + $0x20] ss:$8 sps:$4 sm:$0xff]  }
  0x21   : > { %582 = vmatpush1.bf16.msra.mxu0 %v1652_v11  ;;  %924 = vmatprep.subr.bf16.mxu1 %v1715_v32  ;;  %v1692_v0 = vld [vmem:[%s1897_s9 + $0x34] ss:$8 sps:$4 sm:$0xff]   ;;  %v1694_v1 = vld [vmem:[%s1897_s9 + $0x30] ss:$8 sps:$4 sm:$0xff]   ;;  %v1695_v2 = vld [vmem:[%s1897_s9 + $0x44] ss:$8 sps:$4 sm:$0xff]  }
  0x22   : > { %583 = vmatprep.subr.bf16.mxu0 %v1653_v12  ;;  %v1697_v3 = vld [vmem:[%s1897_s9 + $0x40] ss:$8 sps:$4 sm:$0xff]   ;;  %v1698_v4 = vld [vmem:[%s1897_s9 + $0x54] ss:$8 sps:$4 sm:$0xff]   ;;  %v1700_v6 = vld [vmem:[%s1897_s9 + $0x50] ss:$8 sps:$4 sm:$0xff]  }
  0x23   : > { %v299_v5 = vld [vmem:[%s1897_s9 + $0x60] sm:$0xff]  ;;  %v1745_v11 = vld [vmem:[%s2411_s3 + $0x94] ss:$8 sps:$4 sm:$0xff]   ;;  %v1747_v12 = vld [vmem:[%s2411_s3 + $0x90] ss:$8 sps:$4 sm:$0xff]  }
  0x24   : > { %925 = vmatpush1.bf16.msra.mxu1 %v1717_v36  ;;  %v1494_v7 = vcombine.high %v299_v5, %v299_v5  ;;  %v1493_v8 = vcombine.low %v299_v5, %v299_v5  ;;  %v1742_v9 = vld [vmem:[%s2411_s3 + $0xa4] ss:$8 sps:$4 sm:$0xff]   ;;  %v1744_v10 = vld [vmem:[%s2411_s3 + $0xa0] ss:$8 sps:$4 sm:$0xff]   ;;  %v2091_v19 = vld [vmem:[%s2413_s5 + $0x54] ss:$8 sps:$4 sm:$0xff]  }
  0x25   : > { %584 = vmatpush1.bf16.msra.mxu0 %v1655_v14  ;;  %926 = vmatprep.subr.bf16.mxu1 %v1718_v38  ;;  %v1748_v13 = vld [vmem:[%s2411_s3 + $0x84] ss:$8 sps:$4 sm:$0xff]   ;;  %v1750_v14 = vld [vmem:[%s2411_s3 + $0x80] ss:$8 sps:$4 sm:$0xff]   ;;  %v2097_v20 = vld [vmem:[%s2413_s5 + $0x50] ss:$8 sps:$4 sm:$0xff]  }
  0x26   : > { %585 = vmatprep.subr.bf16.mxu0 %v1656_v15  ;;  %v2071_v15 = vld [vmem:[%s2413_s5 + $0x70] ss:$8 sps:$4 sm:$0xff]   ;;  %v2103_v21 = vld [vmem:[%s2413_s5 + $0x44] ss:$8 sps:$4 sm:$0xff]   ;;  %v2115_v23 = vld [vmem:[%s2413_s5 + $0x34] ss:$8 sps:$4 sm:$0xff]  }
  0x27   : > { %v2121_v24 = vld [vmem:[%s2413_s5 + $0x30] ss:$8 sps:$4 sm:$0xff]   ;;  %v2139_v27 = vld [vmem:[%s2413_s5 + $0x14] ss:$8 sps:$4 sm:$0xff]   ;;  %v2205_v38 = vld [vmem:[%s2413_s5 + $0xc0] ss:$8 sps:$4 sm:$0xff]  }
  0x28   : > { %927 = vmatpush1.bf16.msra.mxu1 %v1720_v39  ;;  %v2145_v28 = vld [vmem:[%s2413_s5 + $0x10] ss:$8 sps:$4 sm:$0xff]   ;;  %v2163_v31 = vld [vmem:[%s2413_s5 + $0xf4] ss:$8 sps:$4 sm:$0xff]  }
  0x29   : > { %586 = vmatpush1.bf16.msra.mxu0 %v1658_v16  ;;  %928 = vmatprep.subr.bf16.mxu1 %v1721_v40  ;;  %v1753_v16 = vld [vmem:[%s2413_s5 + $0x74] ss:$8 sps:$4 sm:$0xff]   ;;  %v2169_v32 = vld [vmem:[%s2413_s5 + $0xf0] ss:$8 sps:$4 sm:$0xff]  }
  0x2a   : > { %587 = vmatprep.subr.bf16.mxu0 %v1659_v17  ;;  %v2079_v17 = vld [vmem:[%s2413_s5 + $0x64] ss:$8 sps:$4 sm:$0xff]   ;;  %v2193_v36 = vld [vmem:[%s2413_s5 + $0xd0] ss:$8 sps:$4 sm:$0xff]   ;;  %v2211_v39 = vld [vmem:[%s2413_s5 + $0xb4] ss:$8 sps:$4 sm:$0xff]  }
  0x2b   : > { %v2217_v40 = vld [vmem:[%s2413_s5 + $0xb0] ss:$8 sps:$4 sm:$0xff]  }
  0x2c   : > { %929 = vmatpush1.bf16.msra.mxu1 %v1723_v43 }
  0x2d   : > { %588 = vmatpush2.bf16.msra.mxu0 %v1661_v18  ;;  %930 = vmatprep.subr.bf16.mxu1 %v1724_v44  ;;  %v2085_v18 = vld [vmem:[%s2413_s5 + $0x60] ss:$8 sps:$4 sm:$0xff]  }
  0x2e   : > { %589 = vmatprep.subr.bf16.mxu0 %v1662_v22  ;;  %v2109_v22 = vld [vmem:[%s2413_s5 + $0x40] ss:$8 sps:$4 sm:$0xff]  }
  0x30   : > { %931 = vmatpush1.bf16.msra.mxu1 %v1726_v47 }
  0x31   : > { %590 = vmatpush2.bf16.msra.mxu0 %v1664_v25  ;;  %932 = vmatprep.subr.bf16.mxu1 %v1727_v48  ;;  %v2127_v25 = vld [vmem:[%s2413_s5 + $0x24] ss:$8 sps:$4 sm:$0xff]  }
  0x32   : > { %591 = vmatprep.subr.bf16.mxu0 %v1665_v26  ;;  %v2133_v26 = vld [vmem:[%s2413_s5 + $0x20] ss:$8 sps:$4 sm:$0xff]  }
  0x34   : > { %933 = vmatpush2.bf16.msra.mxu1 %v1729_v50 }
  0x35   : > { %592 = vmatpush2.bf16.msra.mxu0 %v1667_v29  ;;  %934 = vmatprep.subr.bf16.mxu1 %v1730_v52  ;;  %v2151_v29 = vld [vmem:[%s2413_s5 + $0x4] ss:$8 sps:$4 sm:$0xff]  }
  0x36   : > { %593 = vmatprep.subr.bf16.mxu0 %v1668_v30  ;;  %v2157_v30 = vld [vmem:[%s2413_s5] ss:$8 sps:$4 sm:$0xff]  }
  0x38   : > { %935 = vmatpush2.bf16.msra.mxu1 %v1732_v54 }
  0x39   : > { %594 = vmatpush2.bf16.msra.mxu0 %v1670_v33  ;;  %936 = vmatprep.subr.bf16.mxu1 %v1733_v55  ;;  %v2175_v33 = vld [vmem:[%s2413_s5 + $0xe4] ss:$8 sps:$4 sm:$0xff]  }
  0x3a   : > { %595 = vmatprep.subr.bf16.mxu0 %v1671_v34  ;;  %v2181_v34 = vld [vmem:[%s2413_s5 + $0xe0] ss:$8 sps:$4 sm:$0xff]  }
  0x3c   : > { %937 = vmatpush2.bf16.msra.mxu1 %v1735_v56 }
  0x3d   : > { %596 = vmatpush2.bf16.msra.mxu0 %v1673_v35  ;;  %938 = vmatprep.subr.bf16.mxu1 %v1736_v58  ;;  %v2187_v35 = vld [vmem:[%s2413_s5 + $0xd4] ss:$8 sps:$4 sm:$0xff]  }
  0x3e   : > { %597 = vmatprep.subr.bf16.mxu0 %v1674_v37  ;;  %v2199_v37 = vld [vmem:[%s2413_s5 + $0xc4] ss:$8 sps:$4 sm:$0xff]  }
  0x40   : > { %939 = vmatpush2.bf16.msra.mxu1 %v1738_v60 }
  0x41   : > { %598 = vmatpush2.bf16.msra.mxu0 %v1676_v41  ;;  %940 = vmatprep.subr.bf16.mxu1 %v1739_v61  ;;  %v334_v41 = vlaneseq }
  0x42   : > { %599 = vmatprep.subr.bf16.mxu0 %v1677_v42 }
  0x43   : > { %v335_v42 = vshrl.u32 %v334_v41, 7 }
  0x44   : > { %941 = vmatpush2.bf16.msra.mxu1 %v1741_v62 }
  0x45   : > { %600 = vmatpush2.bf16.msra.mxu0 %v1679_v45  ;;  %942 = vmatprep.subr.bf16.mxu1 %v1742_v9  ;;  %v2221_v43 = vsub.s32 1, %v335_v42  ;;  %v2223_v44 = vsub.s32 0, %v335_v42  ;;  %v332_v45 = vld [vmem:[%s2410_s2] sm:$0x3] }
  0x46   : > { %601 = vmatprep.subr.bf16.mxu0 %v1680_v46 }
  0x47   : > { %v2229_v47 = vrot.slane %v332_v45, %v2221_v43  ;;  %v2232_v48 = vrot.slane %v332_v45, %v2223_v44 }
  0x48   : > { %943 = vmatpush2.bf16.msra.mxu1 %v1744_v10 }
  0x49   : > { %602 = vmatpush2.bf16.msra.mxu0 %v1682_v49  ;;  %944 = vmatprep.subr.bf16.mxu1 %v1745_v11 }
  0x4a   : > { %1261 = vmatprep.subr.bf16.mxu0 %v1753_v16 }
  0x4c   : > { %604 = vmatmul.mubr.bf16.vlgmr.msra.gmra.mxu0 %v1683_v51  ;;  %945 = vmatpush2.bf16.msra.mxu1 %v1747_v12 }
  0x4d   : > { %613 = vmatprep.mubr.bf16.mxu0 %v1686_v53  ;;  %946 = vmatprep.subr.bf16.mxu1 %v1748_v13 }
  0x4e   : > { %1262 = vmatpush1.bf16.msra.mxu0 %v2071_v15 }
  0x4f   : > { %1263 = vmatprep.subr.bf16.mxu0 %v2079_v17 }
  0x50   : > { %947 = vmatpush2.bf16.msra.mxu1 %v1750_v14 }
  0x51   : > { %1595 = vmatprep.subr.bf16.mxu1 %v1753_v16 }
  0x52   : > { %1264 = vmatpush1.bf16.msra.mxu0 %v2085_v18 }
  0x53   : > { %1265 = vmatprep.subr.bf16.mxu0 %v2091_v19 }
  0x54   : > { %614 = vmatmul.mubr.bf16.gmra.mxu0 %v1688_v57 }
  0x55   : > { %623 = vmatprep.mubr.bf16.mxu0 %v1689_v59 }
  0x56   : > { %1266 = vmatpush1.bf16.msra.mxu0 %v2097_v20 }
  0x57   : > { %1267 = vmatprep.subr.bf16.mxu0 %v2103_v21 }
  0x5a   : > { %1268 = vmatpush1.bf16.msra.mxu0 %v2109_v22 }
  0x5b   : > { %1269 = vmatprep.subr.bf16.mxu0 %v2115_v23 }
  0x5c   : > { %624 = vmatmul.mubr.bf16.gmra.mxu0 %v1691_v63 }
  0x5d   : > { %633 = vmatprep.mubr.bf16.mxu0 %v1692_v0 }
  0x5e   : > { %1270 = vmatpush1.bf16.msra.mxu0 %v2121_v24 }
  0x5f   : > { %1271 = vmatprep.subr.bf16.mxu0 %v2127_v25 }
  0x62   : > { %1272 = vmatpush1.bf16.msra.mxu0 %v2133_v26 }
  0x63   : > { %1273 = vmatprep.subr.bf16.mxu0 %v2139_v27 }
  0x64   : > { %634 = vmatmul.mubr.bf16.gmra.mxu0 %v1694_v1 }
  0x65   : > { %643 = vmatprep.mubr.bf16.mxu0 %v1695_v2 }
  0x66   : > { %1274 = vmatpush1.bf16.msra.mxu0 %v2145_v28 }
  0x67   : > { %1275 = vmatprep.subr.bf16.mxu0 %v2151_v29 }
  0x6a   : > { %1276 = vmatpush1.bf16.msra.mxu0 %v2157_v30 }
  0x6b   : > { %1277 = vmatprep.subr.bf16.mxu0 %v2163_v31 }
  0x6c   : > { %644 = vmatmul.mubr.bf16.gmra.mxu0 %v1697_v3 }
  0x6d   : > { %653 = vmatprep.mubr.bf16.mxu0 %v1698_v4 }
  0x6e   : > { %1278 = vmatpush2.bf16.msra.mxu0 %v2169_v32 }
  0x6f   : > { %1279 = vmatprep.subr.bf16.mxu0 %v2175_v33 }
  0x72   : > { %1280 = vmatpush2.bf16.msra.mxu0 %v2181_v34 }
  0x73   : > { %1281 = vmatprep.subr.bf16.mxu0 %v2187_v35 }
  0x74   : > { %654 = vmatmul.mubr.bf16.gmra.mxu0 %v1700_v6 }
  0x75   : > { %663 = vmatprep.mubr.bf16.mxu0 %v1494_v7 }
  0x76   : > { %1282 = vmatpush2.bf16.msra.mxu0 %v2193_v36 }
  0x77   : > { %1283 = vmatprep.subr.bf16.mxu0 %v2199_v37 }
  0x7a   : > { %1284 = vmatpush2.bf16.msra.mxu0 %v2205_v38 }
  0x7b   : > { %1285 = vmatprep.subr.bf16.mxu0 %v2211_v39 }
  0x7c   : > { %664 = vmatmul.mubr.bf16.gmra.mxu0 %v1493_v8 }
  0x7e   : > { %1286 = vmatpush2.bf16.msra.mxu0 %v2217_v40 }
 0x10c   : > { %v605_v46 = vpop.f32.mrf.mxu0 }
 0x10d   : > { %v606_v53 = vadd.f32 %v605_v46, %v2232_v48 }
 0x10e   : > { %v607_v49 = vpop.f32.mrf.mxu0 }
 0x10f   : > { %v608_v51 = vadd.f32 %v607_v49, %v2229_v47  ;;  %v672_v60 = vmax.f32 %v606_v53, 0.0 }
 0x110   : > { %v609_v50 = vpop.f32.mrf.mxu0 }
 0x111   : > { %v610_v52 = vadd.f32 %v609_v50, %v2232_v48  ;;  %v673_v58 = vmax.f32 %v608_v51, 0.0 }
 0x112   : > { %v611_v54 = vpop.f32.mrf.mxu0 }
 0x113   : > { %v612_v55 = vadd.f32 %v611_v54, %v2229_v47  ;;  %v674_v56 = vmax.f32 %v610_v52, 0.0 }
 0x114   : > { %v615_v57 = vpop.f32.mrf.mxu0 }
 0x115   : > { %v675_v59 = vmax.f32 %v612_v55, 0.0  ;;  %v698_v63 = vpack.c.bf16 %v674_v56, %v672_v60  ;;  %v616_v3 = vadd.f32 %v615_v57, %v2232_v48 }
 0x116   : > { %v617_v61 = vpop.f32.mrf.mxu0 }
 0x117   : > { %v699_v62 = vpack.c.bf16 %v675_v59, %v673_v58  ;;  %v618_v1 = vadd.f32 %v617_v61, %v2229_v47  ;;  %v676_v10 = vmax.f32 %v616_v3, 0.0 }
 0x118   : > { %v619_v0 = vpop.f32.mrf.mxu0 }
 0x119   : > { %v620_v2 = vadd.f32 %v619_v0, %v2232_v48  ;;  %948 = vmatprep.mubr.bf16.mxu1 %v699_v62  ;;  %v677_v8 = vmax.f32 %v618_v1, 0.0 }
 0x11a   : > { %v621_v4 = vpop.f32.mrf.mxu0  ;;  %949 = vmatmul.mubr.bf16.vlgmr.msra.gmra.mxu1 %v698_v63 }
 0x11b   : > { %v622_v5 = vadd.f32 %v621_v4, %v2229_v47  ;;  %1611 = vmatpush1.bf16.msra.mxu1 %v2071_v15  ;;  %v678_v6 = vmax.f32 %v620_v2, 0.0 }
 0x11c   : > { %v625_v7 = vpop.f32.mrf.mxu0  ;;  %1596 = vmatprep.subr.bf16.mxu1 %v2079_v17 }
 0x11d   : > { %v679_v9 = vmax.f32 %v622_v5, 0.0  ;;  %v700_v13 = vpack.c.bf16 %v678_v6, %v676_v10  ;;  %v626_v15 = vadd.f32 %v625_v7, %v2232_v48 }
 0x11e   : > { %v627_v11 = vpop.f32.mrf.mxu0 }
 0x11f   : > { %v701_v12 = vpack.c.bf16 %v679_v9, %v677_v8  ;;  %1612 = vmatpush1.bf16.msra.mxu1 %v2085_v18  ;;  %v628_v16 = vadd.f32 %v627_v11, %v2229_v47 }
 0x120   : > { %v629_v14 = vpop.f32.mrf.mxu0  ;;  %1597 = vmatprep.subr.bf16.mxu1 %v2091_v19  ;;  %v680_v19 = vmax.f32 %v626_v15, 0.0 }
 0x121   : > { %v630_v41 = vadd.f32 %v629_v14, %v2232_v48  ;;  %958 = vmatprep.mubr.bf16.mxu1 %v701_v12  ;;  %v681_v18 = vmax.f32 %v628_v16, 0.0 }
 0x122   : > { %v631_v42 = vpop.f32.mrf.mxu0  ;;  %959 = vmatmul.mubr.bf16.gmra.mxu1 %v700_v13 }
 0x123   : > { %v632_v17 = vadd.f32 %v631_v42, %v2229_v47  ;;  %1613 = vmatpush1.bf16.msra.mxu1 %v2097_v20  ;;  %v682_v45 = vmax.f32 %v630_v41, 0.0 }
 0x124   : > { %v635_v46 = vpop.f32.mrf.mxu0  ;;  %1598 = vmatprep.subr.bf16.mxu1 %v2103_v21 }
 0x125   : > { %v683_v49 = vmax.f32 %v632_v17, 0.0  ;;  %v702_v52 = vpack.c.bf16 %v682_v45, %v680_v19  ;;  %v636_v20 = vadd.f32 %v635_v46, %v2232_v48 }
 0x126   : > { %v637_v50 = vpop.f32.mrf.mxu0 }
 0x127   : > { %v703_v51 = vpack.c.bf16 %v683_v49, %v681_v18  ;;  %1614 = vmatpush1.bf16.msra.mxu1 %v2109_v22  ;;  %v638_v54 = vadd.f32 %v637_v50, %v2229_v47 }
 0x128   : > { %v639_v53 = vpop.f32.mrf.mxu0  ;;  %1599 = vmatprep.subr.bf16.mxu1 %v2115_v23  ;;  %v684_v23 = vmax.f32 %v636_v20, 0.0 }
 0x129   : > { %v640_v55 = vadd.f32 %v639_v53, %v2232_v48  ;;  %968 = vmatprep.mubr.bf16.mxu1 %v703_v51  ;;  %v685_v22 = vmax.f32 %v638_v54, 0.0 }
 0x12a   : > { %v641_v56 = vpop.f32.mrf.mxu0  ;;  %969 = vmatmul.mubr.bf16.gmra.mxu1 %v702_v52 }
 0x12b   : > { %v642_v21 = vadd.f32 %v641_v56, %v2229_v47  ;;  %1615 = vmatpush1.bf16.msra.mxu1 %v2121_v24  ;;  %v686_v57 = vmax.f32 %v640_v55, 0.0 }
 0x12c   : > { %v645_v58 = vpop.f32.mrf.mxu0  ;;  %1600 = vmatprep.subr.bf16.mxu1 %v2127_v25 }
 0x12d   : > { %v687_v59 = vmax.f32 %v642_v21, 0.0  ;;  %v704_v62 = vpack.c.bf16 %v686_v57, %v684_v23  ;;  %v646_v24 = vadd.f32 %v645_v58, %v2232_v48 }
 0x12e   : > { %v647_v60 = vpop.f32.mrf.mxu0 }
 0x12f   : > { %v705_v61 = vpack.c.bf16 %v687_v59, %v685_v22  ;;  %1616 = vmatpush1.bf16.msra.mxu1 %v2133_v26  ;;  %v648_v0 = vadd.f32 %v647_v60, %v2229_v47 }
 0x130   : > { %v649_v63 = vpop.f32.mrf.mxu0  ;;  %1601 = vmatprep.subr.bf16.mxu1 %v2139_v27  ;;  %v688_v27 = vmax.f32 %v646_v24, 0.0 }
 0x131   : > { %v650_v1 = vadd.f32 %v649_v63, %v2232_v48  ;;  %978 = vmatprep.mubr.bf16.mxu1 %v705_v61  ;;  %v689_v26 = vmax.f32 %v648_v0, 0.0 }
 0x132   : > { %v651_v2 = vpop.f32.mrf.mxu0  ;;  %979 = vmatmul.mubr.bf16.gmra.mxu1 %v704_v62 }
 0x133   : > { %v652_v25 = vadd.f32 %v651_v2, %v2229_v47  ;;  %1617 = vmatpush1.bf16.msra.mxu1 %v2145_v28  ;;  %v690_v3 = vmax.f32 %v650_v1, 0.0 }
 0x134   : > { %v655_v4 = vpop.f32.mrf.mxu0  ;;  %1602 = vmatprep.subr.bf16.mxu1 %v2151_v29 }
 0x135   : > { %v691_v5 = vmax.f32 %v652_v25, 0.0  ;;  %v706_v8 = vpack.c.bf16 %v690_v3, %v688_v27  ;;  %v656_v28 = vadd.f32 %v655_v4, %v2232_v48 }
 0x136   : > { %v657_v6 = vpop.f32.mrf.mxu0 }
 0x137   : > { %v707_v7 = vpack.c.bf16 %v691_v5, %v689_v26  ;;  %1618 = vmatpush1.bf16.msra.mxu1 %v2157_v30  ;;  %v658_v10 = vadd.f32 %v657_v6, %v2229_v47 }
 0x138   : > { %v659_v9 = vpop.f32.mrf.mxu0  ;;  %1603 = vmatprep.subr.bf16.mxu1 %v2163_v31  ;;  %v692_v31 = vmax.f32 %v656_v28, 0.0 }
 0x139   : > { %v660_v11 = vadd.f32 %v659_v9, %v2232_v48  ;;  %988 = vmatprep.mubr.bf16.mxu1 %v707_v7  ;;  %v693_v30 = vmax.f32 %v658_v10, 0.0 }
 0x13a   : > { %v661_v12 = vpop.f32.mrf.mxu0  ;;  %989 = vmatmul.mubr.bf16.gmra.mxu1 %v706_v8 }
 0x13b   : > { %v662_v29 = vadd.f32 %v661_v12, %v2229_v47  ;;  %1619 = vmatpush2.bf16.msra.mxu1 %v2169_v32  ;;  %v694_v13 = vmax.f32 %v660_v11, 0.0 }
 0x13c   : > { %v665_v14 = vpop.f32.mrf.mxu0  ;;  %1604 = vmatprep.subr.bf16.mxu1 %v2175_v33 }
 0x13d   : > { %v695_v16 = vmax.f32 %v662_v29, 0.0  ;;  %v666_v41 = vadd.f32 %v665_v14, %v2232_v48  ;;  %v708_v45 = vpack.c.bf16 %v694_v13, %v692_v31 }
 0x13e   : > { %v667_v15 = vpop.f32.mrf.mxu0 }
 0x13f   : > { %v709_v42 = vpack.c.bf16 %v695_v16, %v693_v30  ;;  %v668_v17 = vadd.f32 %v667_v15, %v2229_v47  ;;  %1620 = vmatpush2.bf16.msra.mxu1 %v2181_v34  ;;  %v696_v18 = vmax.f32 %v666_v41, 0.0  ;;  %v1792_v34 = vld [vmem:[%s2413_s5 + $0xa4] ss:$8 sps:$4 sm:$0xff]  }
 0x140   : > { %v669_v46 = vpop.f32.mrf.mxu0  ;;  %1605 = vmatprep.subr.bf16.mxu1 %v2187_v35  ;;  %v1790_v35 = vld [vmem:[%s2413_s5 + $0xa0] ss:$8 sps:$4 sm:$0xff]   ;;  %1287 = vmatprep.subr.bf16.mxu0 %v1792_v34 }
 0x141   : > { %v697_v32 = vmax.f32 %v668_v17, 0.0  ;;  %998 = vmatprep.mubr.bf16.mxu1 %v709_v42  ;;  %v710_v48 = vpack.c.bf16 %v696_v18, %v696_v18  ;;  %1288 = vmatpush2.bf16.msra.mxu0 %v1790_v35 }
 0x142   : > { %999 = vmatmul.mubr.bf16.gmra.mxu1 %v708_v45  ;;  %v670_v33 = vpop.f32.mrf.mxu0 }
 0x143   : > { %v711_v49 = vpack.c.bf16 %v697_v32, %v697_v32  ;;  %1621 = vmatpush2.bf16.msra.mxu1 %v2193_v36  ;;  %v1795_v36 = vld [vmem:[%s2413_s5 + $0x94] ss:$8 sps:$4 sm:$0xff]  }
 0x144   : > { %1606 = vmatprep.subr.bf16.mxu1 %v2199_v37  ;;  %v1793_v37 = vld [vmem:[%s2413_s5 + $0x90] ss:$8 sps:$4 sm:$0xff]   ;;  %1289 = vmatprep.subr.bf16.mxu0 %v1795_v36 }
 0x145   : > { %1008 = vmatprep.mubr.bf16.mxu1 %v711_v49  ;;  %1290 = vmatpush2.bf16.msra.mxu0 %v1793_v37 }
 0x147   : > { %1622 = vmatpush2.bf16.msra.mxu1 %v2205_v38  ;;  %v1798_v38 = vld [vmem:[%s2413_s5 + $0x84] ss:$8 sps:$4 sm:$0xff]  }
 0x148   : > { %1607 = vmatprep.subr.bf16.mxu1 %v2211_v39  ;;  %v1796_v39 = vld [vmem:[%s2413_s5 + $0x80] ss:$8 sps:$4 sm:$0xff]   ;;  %1291 = vmatprep.subr.bf16.mxu0 %v1798_v38 }
 0x149   : > { %1292 = vmatpush2.bf16.msra.mxu0 %v1796_v39 }
 0x14a   : > { %1009 = vmatmul.mubr.bf16.gmra.mxu1 %v710_v48 }
 0x14b   : > { %1623 = vmatpush2.bf16.msra.mxu1 %v2217_v40  ;;  %v744_v40 = vld [vmem:[%s2412_s4] sm:$0x3] }
 0x14c   : > { %1608 = vmatprep.subr.bf16.mxu1 %v1792_v34  ;;  %v2307_v19 = vrot.slane %v744_v40, %v2221_v43  ;;  %v2310_v50 = vrot.slane %v744_v40, %v2223_v44 }
 0x14f   : > { %1624 = vmatpush2.bf16.msra.mxu1 %v1790_v35 }
 0x150   : > { %1609 = vmatprep.subr.bf16.mxu1 %v1795_v36 }
 0x153   : > { %1625 = vmatpush2.bf16.msra.mxu1 %v1793_v37 }
 0x154   : > { %1610 = vmatprep.subr.bf16.mxu1 %v1798_v38 }
 0x157   : > { %1626 = vmatpush2.bf16.msra.mxu1 %v1796_v39 }
 0x1da   : > { %v950_v47 = vpop.f32.mrf.mxu1 }
 0x1db   : > { %v951_v55 = vadd.f32 %v950_v47, %v2310_v50 }
 0x1dc   : > { %v952_v51 = vpop.f32.mrf.mxu1 }
 0x1dd   : > { %v953_v53 = vadd.f32 %v952_v51, %v2307_v19  ;;  %v1017_v59 = vmax.f32 %v951_v55, 0.0 }
 0x1de   : > { %v954_v52 = vpop.f32.mrf.mxu1 }
 0x1df   : > { %v955_v54 = vadd.f32 %v954_v52, %v2310_v50  ;;  %v1018_v58 = vmax.f32 %v953_v53, 0.0 }
 0x1e0   : > { %v956_v20 = vpop.f32.mrf.mxu1 }
 0x1e1   : > { %v957_v56 = vadd.f32 %v956_v20, %v2307_v19  ;;  %v1019_v21 = vmax.f32 %v955_v54, 0.0 }
 0x1e2   : > { %v960_v57 = vpop.f32.mrf.mxu1 }
 0x1e3   : > { %v1020_v22 = vmax.f32 %v957_v56, 0.0  ;;  %v1043_v61 = vpack.c.bf16 %v1019_v21, %v1017_v59  ;;  %v961_v1 = vadd.f32 %v960_v57, %v2310_v50 }
 0x1e4   : > { %v962_v23 = vpop.f32.mrf.mxu1 }
 0x1e5   : > { %v1044_v60 = vpack.c.bf16 %v1020_v22, %v1018_v58  ;;  %v963_v63 = vadd.f32 %v962_v23, %v2307_v19  ;;  %v1021_v5 = vmax.f32 %v961_v1, 0.0 }
 0x1e6   : > { %v964_v62 = vpop.f32.mrf.mxu1 }
 0x1e7   : > { %v965_v0 = vadd.f32 %v964_v62, %v2310_v50  ;;  %1293 = vmatprep.mubr.bf16.mxu0 %v1044_v60  ;;  %v1022_v4 = vmax.f32 %v963_v63, 0.0 }
 0x1e8   : > { %v966_v24 = vpop.f32.mrf.mxu1  ;;  %1294 = vmatmul.mubr.bf16.vlgmr.msra.gmra.mxu0 %v1043_v61 }
 0x1e9   : > { %v967_v2 = vadd.f32 %v966_v24, %v2307_v19  ;;  %v1023_v25 = vmax.f32 %v965_v0, 0.0 }
 0x1ea   : > { %v970_v3 = vpop.f32.mrf.mxu1 }
 0x1eb   : > { %v1024_v26 = vmax.f32 %v967_v2, 0.0  ;;  %v1045_v7 = vpack.c.bf16 %v1023_v25, %v1021_v5  ;;  %v971_v11 = vadd.f32 %v970_v3, %v2310_v50 }
 0x1ec   : > { %v972_v27 = vpop.f32.mrf.mxu1 }
 0x1ed   : > { %v1046_v6 = vpack.c.bf16 %v1024_v26, %v1022_v4  ;;  %v973_v9 = vadd.f32 %v972_v27, %v2307_v19  ;;  %v1025_v16 = vmax.f32 %v971_v11, 0.0 }
 0x1ee   : > { %v974_v8 = vpop.f32.mrf.mxu1 }
 0x1ef   : > { %v975_v10 = vadd.f32 %v974_v8, %v2310_v50  ;;  %1303 = vmatprep.mubr.bf16.mxu0 %v1046_v6  ;;  %v1026_v14 = vmax.f32 %v973_v9, 0.0 }
 0x1f0   : > { %v976_v28 = vpop.f32.mrf.mxu1  ;;  %1304 = vmatmul.mubr.bf16.gmra.mxu0 %v1045_v7 }
 0x1f1   : > { %v977_v12 = vadd.f32 %v976_v28, %v2307_v19  ;;  %v1027_v29 = vmax.f32 %v975_v10, 0.0  ;;  %v1089_v28 = vld [vmem:[%s2414_s6] sm:$0x3] }
 0x1f2   : > { %v980_v13 = vpop.f32.mrf.mxu1 }
 0x1f3   : > { %v1028_v30 = vmax.f32 %v977_v12, 0.0  ;;  %v1047_v15 = vpack.c.bf16 %v1027_v29, %v1025_v16  ;;  %v981_v46 = vadd.f32 %v980_v13, %v2310_v50  ;;  %v2342_v12 = vrot.slane %v1089_v28, %v2223_v44 }
 0x1f4   : > { %v982_v31 = vpop.f32.mrf.mxu1 }
 0x1f5   : > { %v1048_v41 = vpack.c.bf16 %v1028_v30, %v1026_v14  ;;  %v983_v17 = vadd.f32 %v982_v31, %v2307_v19  ;;  %v1029_v35 = vmax.f32 %v981_v46, 0.0 }
 0x1f6   : > { %v984_v42 = vpop.f32.mrf.mxu1 }
 0x1f7   : > { %v985_v45 = vadd.f32 %v984_v42, %v2310_v50  ;;  %1313 = vmatprep.mubr.bf16.mxu0 %v1048_v41  ;;  %v1030_v48 = vmax.f32 %v983_v17, 0.0 }
 0x1f8   : > { %v986_v32 = vpop.f32.mrf.mxu1  ;;  %1314 = vmatmul.mubr.bf16.gmra.mxu0 %v1047_v15 }
 0x1f9   : > { %v987_v18 = vadd.f32 %v986_v32, %v2307_v19  ;;  %v1031_v33 = vmax.f32 %v985_v45, 0.0 }
 0x1fa   : > { %v990_v49 = vpop.f32.mrf.mxu1 }
 0x1fb   : > { %v1032_v34 = vmax.f32 %v987_v18, 0.0  ;;  %v1049_v38 = vpack.c.bf16 %v1031_v33, %v1029_v35  ;;  %v991_v51 = vadd.f32 %v990_v49, %v2310_v50 }
 0x1fc   : > { %v992_v36 = vpop.f32.mrf.mxu1 }
 0x1fd   : > { %v1050_v37 = vpack.c.bf16 %v1032_v34, %v1030_v48  ;;  %v993_v40 = vadd.f32 %v992_v36, %v2307_v19  ;;  %v1033_v21 = vmax.f32 %v991_v51, 0.0 }
 0x1fe   : > { %v994_v39 = vpop.f32.mrf.mxu1 }
 0x1ff   : > { %v995_v47 = vadd.f32 %v994_v39, %v2310_v50  ;;  %1323 = vmatprep.mubr.bf16.mxu0 %v1050_v37  ;;  %v1034_v20 = vmax.f32 %v993_v40, 0.0 }
 0x200   : > { %v996_v52 = vpop.f32.mrf.mxu1  ;;  %1324 = vmatmul.mubr.bf16.gmra.mxu0 %v1049_v38 }
 0x201   : > { %v997_v53 = vadd.f32 %v996_v52, %v2307_v19  ;;  %v1035_v54 = vmax.f32 %v995_v47, 0.0 }
 0x202   : > { %v1000_v55 = vpop.f32.mrf.mxu1 }
 0x203   : > { %v1036_v56 = vmax.f32 %v997_v53, 0.0  ;;  %v1051_v22 = vpack.c.bf16 %v1035_v54, %v1033_v21  ;;  %v1001_v61 = vadd.f32 %v1000_v55, %v2310_v50 }
 0x204   : > { %v1002_v57 = vpop.f32.mrf.mxu1 }
 0x205   : > { %v1052_v58 = vpack.c.bf16 %v1036_v56, %v1034_v20  ;;  %v1003_v23 = vadd.f32 %v1002_v57, %v2307_v19  ;;  %v1037_v25 = vmax.f32 %v1001_v61, 0.0 }
 0x206   : > { %v1004_v59 = vpop.f32.mrf.mxu1 }
 0x207   : > { %v1005_v60 = vadd.f32 %v1004_v59, %v2310_v50  ;;  %1333 = vmatprep.mubr.bf16.mxu1 %v1052_v58  ;;  %v1038_v24 = vmax.f32 %v1003_v23, 0.0 }
 0x208   : > { %v1006_v62 = vpop.f32.mrf.mxu1  ;;  %1334 = vmatmul.mubr.bf16.vlgmr.msra.gmra.mxu1 %v1051_v22 }
 0x209   : > { %v1007_v63 = vadd.f32 %v1006_v62, %v2307_v19  ;;  %v1039_v0 = vmax.f32 %v1005_v60, 0.0 }
 0x20a   : > { %v1010_v1 = vpop.f32.mrf.mxu1 }
 0x20b   : > { %v1040_v2 = vmax.f32 %v1007_v63, 0.0  ;;  %v1053_v5 = vpack.c.bf16 %v1039_v0, %v1037_v25  ;;  %v1011_v27 = vadd.f32 %v1010_v1, %v2310_v50 }
 0x20c   : > { %v1012_v3 = vpop.f32.mrf.mxu1 }
 0x20d   : > { %v1054_v4 = vpack.c.bf16 %v1040_v2, %v1038_v24  ;;  %v1013_v26 = vadd.f32 %v1012_v3, %v2307_v19  ;;  %v1041_v10 = vmax.f32 %v1011_v27, 0.0  ;;  %v2346_v19 = vrot.slane %v1089_v28, %v2221_v43 }
 0x20e   : > { %v1014_v6 = vpop.f32.mrf.mxu1 }
 0x20f   : > { %v1042_v7 = vmax.f32 %v1013_v26, 0.0  ;;  %1343 = vmatprep.mubr.bf16.mxu1 %v1054_v4  ;;  %v1055_v11 = vpack.c.bf16 %v1041_v10, %v1041_v10 }
 0x210   : > { %v1015_v8 = vpop.f32.mrf.mxu1  ;;  %1344 = vmatmul.mubr.bf16.gmra.mxu1 %v1053_v5 }
 0x211   : > { %v1056_v9 = vpack.c.bf16 %v1042_v7, %v1042_v7 }
 0x213   : > { %1353 = vmatprep.mubr.bf16.mxu1 %v1056_v9 }
 0x218   : > { %1354 = vmatmul.mubr.bf16.gmra.mxu1 %v1055_v11 }
 0x2a8   : > { %v1295_v50 = vpop.f32.mrf.mxu0 }
 0x2a9   : > { %v1296_v29 = vadd.f32 %v1295_v50, %v2342_v12 }
 0x2aa   : > { %v1297_v13 = vpop.f32.mrf.mxu0 }
 0x2ab   : > { %v1362_v14 = vmax.f32 %v1296_v29, 0.0  ;;  %v1298_v44 = vadd.f32 %v1297_v13, %v2346_v19 }
 0x2ac   : > { %v1299_v30 = vpop.f32.mrf.mxu0 }
 0x2ad   : > { %1388 = vst [vmem:[%s2352_s25] sm:$0xff] %v1362_v14  ;;  %v1363_v43 = vmax.f32 %v1298_v44, 0.0  ;;  %v1300_v16 = vadd.f32 %v1299_v30, %v2342_v12 }
 0x2ae   : > { %v1301_v31 = vpop.f32.mrf.mxu0 }
 0x2af   : > { %1389 = vst [vmem:[%s2352_s25 + $0x8] sm:$0xff] %v1363_v43  ;;  %v1364_v41 = vmax.f32 %v1300_v16, 0.0  ;;  %v1302_v15 = vadd.f32 %v1301_v31, %v2346_v19 }
 0x2b0   : > { %v1305_v42 = vpop.f32.mrf.mxu0 }
 0x2b1   : > { %1390 = vst [vmem:[%s2352_s25 + $0x10] sm:$0xff] %v1364_v41  ;;  %v1365_v17 = vmax.f32 %v1302_v15, 0.0  ;;  %v1306_v45 = vadd.f32 %v1305_v42, %v2342_v12 }
 0x2b2   : > { %v1307_v46 = vpop.f32.mrf.mxu0 }
 0x2b3   : > { %1391 = vst [vmem:[%s2352_s25 + $0x18] sm:$0xff] %v1365_v17  ;;  %v1366_v32 = vmax.f32 %v1306_v45, 0.0  ;;  %v1308_v18 = vadd.f32 %v1307_v46, %v2346_v19 }
 0x2b4   : > { %v1309_v33 = vpop.f32.mrf.mxu0 }
 0x2b5   : > { %1392 = vst [vmem:[%s2352_s25 + $0x20] sm:$0xff] %v1366_v32  ;;  %v1367_v49 = vmax.f32 %v1308_v18, 0.0  ;;  %v1310_v48 = vadd.f32 %v1309_v33, %v2342_v12 }
 0x2b6   : > { %v1311_v34 = vpop.f32.mrf.mxu0 }
 0x2b7   : > { %1393 = vst [vmem:[%s2352_s25 + $0x28] sm:$0xff] %v1367_v49  ;;  %v1368_v35 = vmax.f32 %v1310_v48, 0.0  ;;  %v1312_v36 = vadd.f32 %v1311_v34, %v2346_v19 }
 0x2b8   : > { %v1315_v37 = vpop.f32.mrf.mxu0 }
 0x2b9   : > { %1394 = vst [vmem:[%s2352_s25 + $0x30] sm:$0xff] %v1368_v35  ;;  %v1369_v38 = vmax.f32 %v1312_v36, 0.0  ;;  %v1316_v39 = vadd.f32 %v1315_v37, %v2342_v12 }
 0x2ba   : > { %v1317_v40 = vpop.f32.mrf.mxu0 }
 0x2bb   : > { %1395 = vst [vmem:[%s2352_s25 + $0x38] sm:$0xff] %v1369_v38  ;;  %v1370_v47 = vmax.f32 %v1316_v39, 0.0  ;;  %v1318_v51 = vadd.f32 %v1317_v40, %v2346_v19 }
 0x2bc   : > { %v1319_v52 = vpop.f32.mrf.mxu0 }
 0x2bd   : > { %1396 = vst [vmem:[%s2352_s25 + $0x40] sm:$0xff] %v1370_v47  ;;  %v1371_v53 = vmax.f32 %v1318_v51, 0.0  ;;  %v1320_v54 = vadd.f32 %v1319_v52, %v2342_v12 }
 0x2be   : > { %v1321_v55 = vpop.f32.mrf.mxu0 }
 0x2bf   : > { %1397 = vst [vmem:[%s2352_s25 + $0x48] sm:$0xff] %v1371_v53  ;;  %v1372_v20 = vmax.f32 %v1320_v54, 0.0  ;;  %v1322_v56 = vadd.f32 %v1321_v55, %v2346_v19 }
 0x2c0   : > { %v1325_v21 = vpop.f32.mrf.mxu0 }
 0x2c1   : > { %1398 = vst [vmem:[%s2352_s25 + $0x50] sm:$0xff] %v1372_v20  ;;  %v1373_v57 = vmax.f32 %v1322_v56, 0.0  ;;  %v1326_v58 = vadd.f32 %v1325_v21, %v2342_v12 }
 0x2c2   : > { %v1327_v22 = vpop.f32.mrf.mxu0 }
 0x2c3   : > { %1399 = vst [vmem:[%s2352_s25 + $0x58] sm:$0xff] %v1373_v57  ;;  %v1374_v59 = vmax.f32 %v1326_v58, 0.0  ;;  %v1328_v23 = vadd.f32 %v1327_v22, %v2346_v19 }
 0x2c4   : > { %v1329_v60 = vpop.f32.mrf.mxu0 }
 0x2c5   : > { %1400 = vst [vmem:[%s2352_s25 + $0x60] sm:$0xff] %v1374_v59  ;;  %v1375_v61 = vmax.f32 %v1328_v23, 0.0  ;;  %v1330_v62 = vadd.f32 %v1329_v60, %v2342_v12 }
 0x2c6   : > { %v1331_v63 = vpop.f32.mrf.mxu0 }
 0x2c7   : > { %1401 = vst [vmem:[%s2352_s25 + $0x68] sm:$0xff] %v1375_v61  ;;  %v1376_v0 = vmax.f32 %v1330_v62, 0.0  ;;  %v1332_v1 = vadd.f32 %v1331_v63, %v2346_v19 }
 0x2c8   : > { %v1335_v24 = vpop.f32.mrf.mxu1 }
 0x2c9   : > { %1402 = vst [vmem:[%s2352_s25 + $0x70] sm:$0xff] %v1376_v0  ;;  %v1377_v2 = vmax.f32 %v1332_v1, 0.0  ;;  %v1336_v25 = vadd.f32 %v1335_v24, %v2342_v12 }
 0x2ca   : > { %v1337_v3 = vpop.f32.mrf.mxu1 }
 0x2cb   : > { %1403 = vst [vmem:[%s2352_s25 + $0x78] sm:$0xff] %v1377_v2  ;;  %v1378_v4 = vmax.f32 %v1336_v25, 0.0  ;;  %v1338_v26 = vadd.f32 %v1337_v3, %v2346_v19 }
 0x2cc   : > { %v1339_v5 = vpop.f32.mrf.mxu1 }
 0x2cd   : > { %1404 = vst [vmem:[%s2352_s25 + $0x80] sm:$0xff] %v1378_v4  ;;  %v1379_v27 = vmax.f32 %v1338_v26, 0.0  ;;  %v1340_v6 = vadd.f32 %v1339_v5, %v2342_v12 }
 0x2ce   : > { %v1341_v7 = vpop.f32.mrf.mxu1 }
 0x2cf   : > { %1405 = vst [vmem:[%s2352_s25 + $0x88] sm:$0xff] %v1379_v27  ;;  %v1380_v8 = vmax.f32 %v1340_v6, 0.0  ;;  %v1342_v9 = vadd.f32 %v1341_v7, %v2346_v19 }
 0x2d0   : > { %v1345_v10 = vpop.f32.mrf.mxu1 }
 0x2d1   : > { %1406 = vst [vmem:[%s2352_s25 + $0x90] sm:$0xff] %v1380_v8  ;;  %v1381_v11 = vmax.f32 %v1342_v9, 0.0  ;;  %v1346_v28 = vadd.f32 %v1345_v10, %v2342_v12 }
 0x2d2   : > { %v1347_v50 = vpop.f32.mrf.mxu1 }
 0x2d3   : > { %1407 = vst [vmem:[%s2352_s25 + $0x98] sm:$0xff] %v1381_v11  ;;  %v1382_v29 = vmax.f32 %v1346_v28, 0.0  ;;  %v1348_v13 = vadd.f32 %v1347_v50, %v2346_v19 }
 0x2d4   : > { %v1349_v14 = vpop.f32.mrf.mxu1 }
 0x2d5   : > { %1408 = vst [vmem:[%s2352_s25 + $0xa0] sm:$0xff] %v1382_v29  ;;  %v1383_v44 = vmax.f32 %v1348_v13, 0.0  ;;  %v1350_v30 = vadd.f32 %v1349_v14, %v2342_v12 }
 0x2d6   : > { %v1351_v43 = vpop.f32.mrf.mxu1 }
 0x2d7   : > { %1409 = vst [vmem:[%s2352_s25 + $0xa8] sm:$0xff] %v1383_v44  ;;  %v1384_v16 = vmax.f32 %v1350_v30, 0.0  ;;  %v1352_v31 = vadd.f32 %v1351_v43, %v2346_v19 }
 0x2d8   : > { %v1355_v41 = vpop.f32.mrf.mxu1 }
 0x2d9   : > { %1410 = vst [vmem:[%s2352_s25 + $0xb0] sm:$0xff] %v1384_v16  ;;  %v1385_v15 = vmax.f32 %v1352_v31, 0.0  ;;  %v1356_v42 = vadd.f32 %v1355_v41, %v2342_v12 }
 0x2da   : > { %v1357_v17 = vpop.f32.mrf.mxu1 }
 0x2db   : > { %1411 = vst [vmem:[%s2352_s25 + $0xb8] sm:$0xff] %v1385_v15  ;;  %v1386_v45 = vmax.f32 %v1356_v42, 0.0  ;;  %v1358_v46 = vadd.f32 %v1357_v17, %v2346_v19 }
 0x2dc   : > { %v1359_v32 = vpop.f32.mrf.mxu1 }
 0x2dd   : > { %1412 = vst [vmem:[%s2352_s25 + $0xc0] sm:$0xff] %v1386_v45  ;;  %v1387_v18 = vmax.f32 %v1358_v46, 0.0 }
 0x2de   : > { %v1360_v33 = vpop.f32.mrf.mxu1 }
 0x2df   : > { %1413 = vst [vmem:[%s2352_s25 + $0xc8] sm:$0xff] %v1387_v18 }
 0x2e0 PF: > { %s17_s24 = sadd.s32 1, %s1805_s24  }
 0x2e1   : > { %p14_p4 = scmp.ge.s32.totalorder %s17_s24, 4  }
 0x2e3   :  { %16 = sbr.rel (!%p14_p4) target bundleno = 1 (0x1), region = 78 }

</bundles_post_ra>
